<compile_context>
chip_gen: v7x
topology: tpu7x:2x2x1
jax: 0.10.0
libtpu: 0.0.40
codegen_flags: <defaults>
</compile_context>

<pallas_src>
import functools

import jax
import jax.numpy as jnp
from jax.experimental import pallas as pl
from jax.experimental.pallas import tpu as pltpu

_LANE = 128


def _gelu(x):
    # tanh-approximate GELU (EUP-friendly), computed in f32.
    # TODO(synk): HF vision models default to exact erf-GELU; swap if tight
    # parity with the wrapped PyTorch model is required.
    return 0.5 * x * (1.0 + jnp.tanh(0.7978845608028654 * (x + 0.044715 * x * x * x)))


def _round_up(x, m):
    return (x + m - 1) // m * m


def vit_classifier_kernel(x_ref, w1_ref, b1_ref, w2_ref, b2_ref, wc_ref, bc_ref,
                          o_ref, acc_ref, *, inv_n):
    """One (batch-tile, token-tile) grid step.

    x_ref  : (TB, TN, P)  bf16 patches          w1_ref: (P, H)  bf16, b1: (1, H) f32
    w2_ref : (H, H)       bf16, b2: (1, H) f32  wc_ref: (H, Cp) bf16, bc: (1, Cp) f32
    o_ref  : (TB, Cp)     f32 logits (written on the last token tile)
    acc_ref: (TB, H)      f32 token-sum accumulator (VMEM scratch)
    """
    t = pl.program_id(1)

    @pl.when(t == 0)
    def _():
        acc_ref[...] = jnp.zeros_like(acc_ref)

    tb, tn, p = x_ref.shape
    # Flatten (TB, TN) so the MXU sees one tall (TB*TN, P) operand.
    x = x_ref[...].reshape(tb * tn, p)

    # patch embedding: bf16 operands, f32 accumulation
    h = jnp.dot(x, w1_ref[...], preferred_element_type=jnp.float32) + b1_ref[...]
    h = _gelu(h)

    # MLP
    h = jnp.dot(h.astype(jnp.bfloat16), w2_ref[...],
                preferred_element_type=jnp.float32) + b2_ref[...]
    h = _gelu(h)

    # partial token-sum for the mean pool
    acc_ref[...] += h.reshape(tb, tn, -1).sum(axis=1)

    # finalize: mean pool (single multiply) + classifier head, lane-dense store
    @pl.when(t == pl.num_programs(1) - 1)
    def _():
        pooled = (acc_ref[...] * inv_n).astype(jnp.bfloat16)
        logits = jnp.dot(pooled, wc_ref[...],
                         preferred_element_type=jnp.float32) + bc_ref[...]
        o_ref[...] = logits.astype(o_ref.dtype)


def wrapped_model_forward(x_nchw, params, *, patch=4, tb=None, tn=None):
    """Equivalent of WrappedModel(model)(inputs) -> logits."""
    B, C, H, W = x_nchw.shape
    assert H % patch == 0 and W % patch == 0
    nh, nw = H // patch, W // patch
    N = nh * nw
    P = C * patch * patch

    # patchify: NCHW -> (B, N, C*p*p)   (plain-JAX glue)
    # TODO(synk): fold the patchify into the kernel's index_map at real
    # ImageNet sizes to avoid the extra HBM round trip.
    xp = x_nchw.reshape(B, C, nh, patch, nw, patch)
    xp = xp.transpose(0, 2, 4, 1, 3, 5).reshape(B, N, P)

    w1, b1, w2, b2, wc, bc = (params['w1'], params['b1'], params['w2'],
                              params['b2'], params['wc'], params['bc'])
    hidden = w1.shape[1]
    num_classes = wc.shape[1]
    assert hidden % _LANE == 0, "hidden must be a multiple of 128 (lane-dense)"

    # zero-pad the patch dim and the class dim to lane multiples (inert padding)
    P_pad = _round_up(P, _LANE)
    C_pad = _round_up(num_classes, _LANE)
    if P_pad != P:
        xp = jnp.pad(xp, ((0, 0), (0, 0), (0, P_pad - P)))
        w1 = jnp.pad(w1, ((0, P_pad - P), (0, 0)))
    if C_pad != num_classes:
        wc = jnp.pad(wc, ((0, 0), (0, C_pad - num_classes)))
        bc = jnp.pad(bc, ((0, 0), (0, C_pad - num_classes)))

    # bf16 MXU operands; biases stay f32 (added to f32 accumulators)
    xp = xp.astype(jnp.bfloat16)
    w1 = w1.astype(jnp.bfloat16)
    w2 = w2.astype(jnp.bfloat16)
    wc = wc.astype(jnp.bfloat16)

    # tile sizes: batch tile TB, token tile TN
    if tb is None:
        tb = B
    if tn is None:
        tn = min(N, 512)
        while N % tn != 0:
            tn //= 2
    assert B % tb == 0 and N % tn == 0
    assert tb % 8 == 0 or tb == B
    assert tn % 8 == 0 or tn == N

    grid = (B // tb, N // tn)

    flops = 2 * B * N * (P_pad * hidden + hidden * hidden) + 2 * B * hidden * C_pad
    bytes_accessed = (xp.size * 2 + w1.size * 2 + w2.size * 2 + wc.size * 2
                      + (b1.size + b2.size + bc.size) * 4 + B * C_pad * 4)

    kernel = functools.partial(vit_classifier_kernel, inv_n=float(1.0 / N))

    out = pl.pallas_call(
        kernel,
        out_shape=jax.ShapeDtypeStruct((B, C_pad), jnp.float32),
        grid=grid,
        in_specs=[
            pl.BlockSpec((tb, tn, P_pad), lambda b, t: (b, t, 0)),   # activations
            pl.BlockSpec((P_pad, hidden), lambda b, t: (0, 0)),      # resident weights
            pl.BlockSpec((1, hidden), lambda b, t: (0, 0)),
            pl.BlockSpec((hidden, hidden), lambda b, t: (0, 0)),
            pl.BlockSpec((1, hidden), lambda b, t: (0, 0)),
            pl.BlockSpec((hidden, C_pad), lambda b, t: (0, 0)),
            pl.BlockSpec((1, C_pad), lambda b, t: (0, 0)),
        ],
        out_specs=pl.BlockSpec((tb, C_pad), lambda b, t: (b, 0)),
        scratch_shapes=[pltpu.VMEM((tb, hidden), jnp.float32)],
        compiler_params=pltpu.CompilerParams(
            dimension_semantics=("parallel", "arbitrary"),
            vmem_limit_bytes=48 * 1024 * 1024),
        cost_estimate=pl.CostEstimate(
            flops=flops,
            transcendentals=2 * B * N * hidden,
            bytes_accessed=bytes_accessed),
    )(xp, w1, b1, w2, b2, wc, bc)

    # slice off the class padding
    return out[:, :num_classes]


def _reference_forward(x_nchw, params, *, patch=4):
    """Pure-JAX f32 reference for tolerance checking."""
    B, C, H, W = x_nchw.shape
    nh, nw = H // patch, W // patch
    xp = x_nchw.reshape(B, C, nh, patch, nw, patch)
    xp = xp.transpose(0, 2, 4, 1, 3, 5).reshape(B, nh * nw, -1)
    h = _gelu(jnp.einsum('bnp,ph->bnh', xp, params['w1']) + params['b1'])
    h = _gelu(jnp.einsum('bnh,hk->bnk', h, params['w2']) + params['b2'])
    pooled = h.mean(axis=1)
    return pooled @ params['wc'] + params['bc']


def init_params(key, *, patch_dim, hidden, num_classes):
    ks = jax.random.split(key, 6)
    scale1 = 1.0 / jnp.sqrt(patch_dim)
    scale2 = 1.0 / jnp.sqrt(hidden)
    return {
        'w1': jax.random.normal(ks[0], (patch_dim, hidden), jnp.float32) * scale1,
        'b1': jnp.zeros((1, hidden), jnp.float32),
        'w2': jax.random.normal(ks[1], (hidden, hidden), jnp.float32) * scale2,
        'b2': jnp.zeros((1, hidden), jnp.float32),
        'wc': jax.random.normal(ks[2], (hidden, num_classes), jnp.float32) * scale2,
        'bc': jnp.zeros((1, num_classes), jnp.float32),
    }


if __name__ == "__main__":
    key = jax.random.PRNGKey(0)
    k_x, k_p = jax.random.split(key)

    B, C, H, W = 2, 4, 16, 16        # small NCHW image batch
    patch = 4
    hidden = 128                     # lane-dense hidden dim
    num_classes = 16                 # stand-in for the 1000 ImageNet classes
    patch_dim = C * patch * patch    # 64 (zero-padded to 128 inside the wrapper)

    x = jax.random.normal(k_x, (B, C, H, W), jnp.float32)
    params = init_params(k_p, patch_dim=patch_dim, hidden=hidden,
                         num_classes=num_classes)

    # tn=8 -> 2 token tiles, exercising the pooled-sum accumulator path.
    logits = wrapped_model_forward(x, params, patch=patch, tn=8)
    logits = jax.block_until_ready(logits)

    assert logits.shape == (B, num_classes)
    assert logits.dtype == jnp.float32

    ref = _reference_forward(x, params, patch=patch)
    assert bool(jnp.all(jnp.isfinite(logits)))
    assert bool(jnp.allclose(logits, ref, atol=1e-1, rtol=1e-1)), (
        "kernel/reference mismatch")

    # TODO(synk): `output_hidden_states=True` only affects the HF output struct,
    # not the returned logits, so hidden-state collection is intentionally omitted.
    print("KERNEL_OK")
</pallas_src>

<mosaic_0001>
module attributes {stable_mosaic.version = 11 : i64} {
  func.func @vit_classifier_kernel(%arg0: i32, %arg1: i32, %arg2: memref<2x8x128xbf16, #tpu.memory_space<vmem>>, %arg3: memref<128x128xbf16, #tpu.memory_space<vmem>>, %arg4: memref<1x128xf32, #tpu.memory_space<vmem>>, %arg5: memref<128x128xbf16, #tpu.memory_space<vmem>>, %arg6: memref<1x128xf32, #tpu.memory_space<vmem>>, %arg7: memref<128x128xbf16, #tpu.memory_space<vmem>>, %arg8: memref<1x128xf32, #tpu.memory_space<vmem>>, %arg9: memref<2x128xf32, #tpu.memory_space<vmem>>, %arg10: memref<2x128xf32, #tpu.memory_space<vmem>>) attributes {dimension_semantics = [#tpu.dimension_semantics<parallel>, #tpu.dimension_semantics<arbitrary>], iteration_bounds = array<i64: 1, 2>, scalar_prefetch = 0 : i64, scratch_operands = 1 : i64, tpu.core_type = #tpu.core_type<tc>, window_params = [{transform_indices = @transform_0, window_bounds = array<i64: 2, 8, 128>}, {pipeline_mode = #tpu.pipeline_mode<synchronous>, transform_indices = @transform_1, window_bounds = array<i64: 128, 128>}, {pipeline_mode = #tpu.pipeline_mode<synchronous>, transform_indices = @transform_2, window_bounds = array<i64: 1, 128>}, {pipeline_mode = #tpu.pipeline_mode<synchronous>, transform_indices = @transform_3, window_bounds = array<i64: 128, 128>}, {pipeline_mode = #tpu.pipeline_mode<synchronous>, transform_indices = @transform_4, window_bounds = array<i64: 1, 128>}, {pipeline_mode = #tpu.pipeline_mode<synchronous>, transform_indices = @transform_5, window_bounds = array<i64: 128, 128>}, {pipeline_mode = #tpu.pipeline_mode<synchronous>, transform_indices = @transform_6, window_bounds = array<i64: 1, 128>}, {transform_indices = @transform_7, window_bounds = array<i64: 2, 128>}]} {
    %c0_i32 = arith.constant 0 : i32
    %0 = arith.cmpi eq, %arg1, %c0_i32 : i32
    %1 = arith.extui %0 : i1 to i32
    %c0_i32_0 = arith.constant 0 : i32
    %2 = arith.cmpi ne, %1, %c0_i32_0 : i32
    scf.if %2 {
      %cst_26 = arith.constant 0.000000e+00 : f32
      %50 = vector.broadcast %cst_26 : f32 to vector<2x128xf32>
      %c0_27 = arith.constant 0 : index
      %c0_28 = arith.constant 0 : index
      %51 = vector.load %arg10[%c0_27, %c0_28] : memref<2x128xf32, #tpu.memory_space<vmem>>, vector<2x128xf32>
      tpu.vector_store %arg10[%c0_27, %c0_28], %50 {strides = array<i32>} : memref<2x128xf32, #tpu.memory_space<vmem>>, vector<2x128xf32>,
    } else {
    }
    %c0 = arith.constant 0 : index
    %c0_1 = arith.constant 0 : index
    %c0_2 = arith.constant 0 : index
    %3 = vector.load %arg2[%c0, %c0_1, %c0_2] : memref<2x8x128xbf16, #tpu.memory_space<vmem>>, vector<2x8x128xbf16>
    %4 = vector.shape_cast %3 : vector<2x8x128xbf16> to vector<16x128xbf16>
    %c0_3 = arith.constant 0 : index
    %c0_4 = arith.constant 0 : index
    %5 = vector.load %arg3[%c0_3, %c0_4] : memref<128x128xbf16, #tpu.memory_space<vmem>>, vector<128x128xbf16>
    %cst = arith.constant dense<0.000000e+00> : vector<16x128xf32>
    %6 = tpu.matmul %4, %5, %cst {dimension_numbers = #tpu.dot_dimension_numbers<[1], [0], [0], [1], [0, 0, 1, 1], [], []>} : vector<16x128xbf16>, vector<128x128xbf16>, vector<16x128xf32> -> vector<16x128xf32>
    %c0_5 = arith.constant 0 : index
    %c0_6 = arith.constant 0 : index
    %7 = vector.load %arg4[%c0_5, %c0_6] : memref<1x128xf32, #tpu.memory_space<vmem>>, vector<1x128xf32>
    %8 = vector.broadcast %7 : vector<1x128xf32> to vector<16x128xf32>
    %9 = arith.addf %6, %8 : vector<16x128xf32>
    %cst_7 = arith.constant 5.000000e-01 : f32
    %10 = vector.broadcast %cst_7 : f32 to vector<16x128xf32>
    %11 = arith.mulf %10, %9 : vector<16x128xf32>
    %cst_8 = arith.constant 4.471500e-02 : f32
    %12 = vector.broadcast %cst_8 : f32 to vector<16x128xf32>
    %13 = arith.mulf %12, %9 : vector<16x128xf32>
    %14 = arith.mulf %13, %9 : vector<16x128xf32>
    %15 = arith.mulf %14, %9 : vector<16x128xf32>
    %16 = arith.addf %9, %15 : vector<16x128xf32>
    %cst_9 = arith.constant 0.797884583 : f32
    %17 = vector.broadcast %cst_9 : f32 to vector<16x128xf32>
    %18 = arith.mulf %17, %16 : vector<16x128xf32>
    %19 = math.tanh %18 : vector<16x128xf32>
    %cst_10 = arith.constant 1.000000e+00 : f32
    %20 = vector.broadcast %cst_10 : f32 to vector<16x128xf32>
    %21 = arith.addf %20, %19 : vector<16x128xf32>
    %22 = arith.mulf %11, %21 : vector<16x128xf32>
    %23 = arith.truncf %22 : vector<16x128xf32> to vector<16x128xbf16>
    %c0_11 = arith.constant 0 : index
    %c0_12 = arith.constant 0 : index
    %24 = vector.load %arg5[%c0_11, %c0_12] : memref<128x128xbf16, #tpu.memory_space<vmem>>, vector<128x128xbf16>
    %cst_13 = arith.constant dense<0.000000e+00> : vector<16x128xf32>
    %25 = tpu.matmul %23, %24, %cst_13 {dimension_numbers = #tpu.dot_dimension_numbers<[1], [0], [0], [1], [0, 0, 1, 1], [], []>} : vector<16x128xbf16>, vector<128x128xbf16>, vector<16x128xf32> -> vector<16x128xf32>
    %c0_14 = arith.constant 0 : index
    %c0_15 = arith.constant 0 : index
    %26 = vector.load %arg6[%c0_14, %c0_15] : memref<1x128xf32, #tpu.memory_space<vmem>>, vector<1x128xf32>
    %27 = vector.broadcast %26 : vector<1x128xf32> to vector<16x128xf32>
    %28 = arith.addf %25, %27 : vector<16x128xf32>
    %cst_16 = arith.constant 5.000000e-01 : f32
    %29 = vector.broadcast %cst_16 : f32 to vector<16x128xf32>
    %30 = arith.mulf %29, %28 : vector<16x128xf32>
    %cst_17 = arith.constant 4.471500e-02 : f32
    %31 = vector.broadcast %cst_17 : f32 to vector<16x128xf32>
    %32 = arith.mulf %31, %28 : vector<16x128xf32>
    %33 = arith.mulf %32, %28 : vector<16x128xf32>
    %34 = arith.mulf %33, %28 : vector<16x128xf32>
    %35 = arith.addf %28, %34 : vector<16x128xf32>
    %cst_18 = arith.constant 0.797884583 : f32
    %36 = vector.broadcast %cst_18 : f32 to vector<16x128xf32>
    %37 = arith.mulf %36, %35 : vector<16x128xf32>
    %38 = math.tanh %37 : vector<16x128xf32>
    %cst_19 = arith.constant 1.000000e+00 : f32
    %39 = vector.broadcast %cst_19 : f32 to vector<16x128xf32>
    %40 = arith.addf %39, %38 : vector<16x128xf32>
    %41 = arith.mulf %30, %40 : vector<16x128xf32>
    %c0_20 = arith.constant 0 : index
    %c0_21 = arith.constant 0 : index
    %42 = vector.load %arg10[%c0_20, %c0_21] : memref<2x128xf32, #tpu.memory_space<vmem>>, vector<2x128xf32>
    %43 = vector.shape_cast %41 : vector<16x128xf32> to vector<2x8x128xf32>
    %cst_22 = arith.constant dense<0.000000e+00> : vector<2x128xf32>
    %44 = vector.multi_reduction <add>, %43, %cst_22 [1] : vector<2x8x128xf32> to vector<2x128xf32>
    %45 = arith.addf %42, %44 : vector<2x128xf32>
    %c0_23 = arith.constant 0 : index
    %c0_24 = arith.constant 0 : index
    %46 = vector.load %arg10[%c0_23, %c0_24] : memref<2x128xf32, #tpu.memory_space<vmem>>, vector<2x128xf32>
    tpu.vector_store %arg10[%c0_23, %c0_24], %45 {strides = array<i32>} : memref<2x128xf32, #tpu.memory_space<vmem>>, vector<2x128xf32>,
    %c1_i32 = arith.constant 1 : i32
    %47 = arith.cmpi eq, %arg1, %c1_i32 : i32
    %48 = arith.extui %47 : i1 to i32
    %c0_i32_25 = arith.constant 0 : i32
    %49 = arith.cmpi ne, %48, %c0_i32_25 : i32
    scf.if %49 {
      %c0_26 = arith.constant 0 : index
      %c0_27 = arith.constant 0 : index
      %50 = vector.load %arg10[%c0_26, %c0_27] : memref<2x128xf32, #tpu.memory_space<vmem>>, vector<2x128xf32>
      %cst_28 = arith.constant 6.250000e-02 : f32
      %51 = vector.broadcast %cst_28 : f32 to vector<2x128xf32>
      %52 = arith.mulf %50, %51 : vector<2x128xf32>
      %53 = arith.truncf %52 : vector<2x128xf32> to vector<2x128xbf16>
      %c0_29 = arith.constant 0 : index
      %c0_30 = arith.constant 0 : index
      %54 = vector.load %arg7[%c0_29, %c0_30] : memref<128x128xbf16, #tpu.memory_space<vmem>>, vector<128x128xbf16>
      %cst_31 = arith.constant dense<0.000000e+00> : vector<2x128xf32>
      %55 = tpu.matmul %53, %54, %cst_31 {dimension_numbers = #tpu.dot_dimension_numbers<[1], [0], [0], [1], [0, 0, 1, 1], [], []>} : vector<2x128xbf16>, vector<128x128xbf16>, vector<2x128xf32> -> vector<2x128xf32>
      %c0_32 = arith.constant 0 : index
      %c0_33 = arith.constant 0 : index
      %56 = vector.load %arg8[%c0_32, %c0_33] : memref<1x128xf32, #tpu.memory_space<vmem>>, vector<1x128xf32>
      %57 = vector.broadcast %56 : vector<1x128xf32> to vector<2x128xf32>
      %58 = arith.addf %55, %57 : vector<2x128xf32>
      %c0_34 = arith.constant 0 : index
      %c0_35 = arith.constant 0 : index
      %59 = vector.load %arg9[%c0_34, %c0_35] : memref<2x128xf32, #tpu.memory_space<vmem>>, vector<2x128xf32>
      tpu.vector_store %arg9[%c0_34, %c0_35], %58 {strides = array<i32>} : memref<2x128xf32, #tpu.memory_space<vmem>>, vector<2x128xf32>,
    } else {
    }
    return
  }
  func.func @transform_0(%arg0: i32, %arg1: i32) -> (i32, i32, i32) {
    %c0_i32 = arith.constant 0 : i32
    %c0_i32_0 = arith.constant 0 : i32
    return %arg0, %arg1, %c0_i32 : i32, i32, i32
  }
  func.func @transform_1(%arg0: i32, %arg1: i32) -> (i32, i32) {
    %c0_i32 = arith.constant 0 : i32
    %c0_i32_0 = arith.constant 0 : i32
    %c0_i32_1 = arith.constant 0 : i32
    return %c0_i32, %c0_i32_0 : i32, i32
  }
  func.func @transform_2(%arg0: i32, %arg1: i32) -> (i32, i32) {
    %c0_i32 = arith.constant 0 : i32
    %c0_i32_0 = arith.constant 0 : i32
    %c0_i32_1 = arith.constant 0 : i32
    return %c0_i32, %c0_i32_0 : i32, i32
  }
  func.func @transform_3(%arg0: i32, %arg1: i32) -> (i32, i32) {
    %c0_i32 = arith.constant 0 : i32
    %c0_i32_0 = arith.constant 0 : i32
    %c0_i32_1 = arith.constant 0 : i32
    return %c0_i32, %c0_i32_0 : i32, i32
  }
  func.func @transform_4(%arg0: i32, %arg1: i32) -> (i32, i32) {
    %c0_i32 = arith.constant 0 : i32
    %c0_i32_0 = arith.constant 0 : i32
    %c0_i32_1 = arith.constant 0 : i32
    return %c0_i32, %c0_i32_0 : i32, i32
  }
  func.func @transform_5(%arg0: i32, %arg1: i32) -> (i32, i32) {
    %c0_i32 = arith.constant 0 : i32
    %c0_i32_0 = arith.constant 0 : i32
    %c0_i32_1 = arith.constant 0 : i32
    return %c0_i32, %c0_i32_0 : i32, i32
  }
  func.func @transform_6(%arg0: i32, %arg1: i32) -> (i32, i32) {
    %c0_i32 = arith.constant 0 : i32
    %c0_i32_0 = arith.constant 0 : i32
    %c0_i32_1 = arith.constant 0 : i32
    return %c0_i32, %c0_i32_0 : i32, i32
  }
  func.func @transform_7(%arg0: i32, %arg1: i32) -> (i32, i32) {
    %c0_i32 = arith.constant 0 : i32
    %c0_i32_0 = arith.constant 0 : i32
    return %arg0, %c0_i32 : i32, i32
  }
}

</mosaic_0001>

<bundles_post_ra>
// kernel: tpu_custom_call.1
= control target key start
LH: loop header
LB: loop body
LE: loop exit
PB: predicated region body
PF: predicated region fallthrough
CT: control target
= control target key end

     0   :  { %s1649_s0 = inlined_call_operand.hbm [shape: bf16[2,16,128], index: 0, kind: input, shape index: {}]   ;;  %s1650_s1 = inlined_call_operand.hbm [shape: bf16[128,128], index: 1, kind: input, shape index: {}]   ;;  %s1651_s2 = inlined_call_operand.vmem [shape: f32[1,128], index: 2, kind: input, shape index: {}]   ;;  %s1652_s3 = inlined_call_operand.hbm [shape: bf16[128,128], index: 3, kind: input, shape index: {}]   ;;  %s1653_s4 = inlined_call_operand.vmem [shape: f32[1,128], index: 4, kind: input, shape index: {}]   ;;  %s1654_s5 = inlined_call_operand.hbm [shape: bf16[128,128], index: 5, kind: input, shape index: {}]   ;;  %s1655_s6 = inlined_call_operand.vmem [shape: f32[1,128], index: 6, kind: input, shape index: {}]   ;;  %s1656_s7 = inlined_call_operand.hbm [shape: f32[2,128], index: 7, kind: output, shape index: {}]  }
   0x1   :  { %1665 = sst [smem:[#allocation17_spill]] %s1653_s4 }
   0x2   :  { %1666 = sst [smem:[#allocation18_spill]] %s1655_s6 }
   0x3   :  { %1667 = sst [smem:[#allocation19_spill]] %s1656_s7 }
   0x4   :  { %12 = vsyncpa [#allocation4], 0 }
   0x5   :  { %14 = vsyncpa [#allocation4 + $0x1], 0 }
   0x6   :  { %15 = vsyncpa [#allocation7], 0 }
   0x7   :  { %16 = vsyncpa [#allocation10], 0 }
   0x8   :  { %17 = vsyncpa [#allocation5], 0  ;;  %s1391_s24 = smov 0   ;;  %s1393_s25 = smov 0  }
   0x9   :  { %s1395_s26 = smov 0   ;;  %s1397_s27 = smov 0  }
   0xa   :  { %s1399_s28 = smov 0   ;;  %s1401_s29 = smov 0  }
   0xb LB: > { %1668 = sst [smem:[#allocation16_spill]] %s1336_s29  ;;  %s1662_s30 = sadd.s32 4294967295, %s1336_s29   ;;  %s1336_s29 = sphi %s1401_s29, %s23_s29   ;;  %s1332_s28 = sphi %s1399_s28, %s1690_s28   ;;  %s1328_s27 = sphi %s1397_s27, %s1689_s27   ;;  %s1324_s26 = sphi %s1395_s26, %s1688_s26   ;;  %s1320_s25 = sphi %s1393_s25, %s1687_s25   ;;  %s1316_s24 = sphi %s1391_s24, %s1686_s24  }
   0xc   : > { %p51_p0 = scmp.ne.s32.totalorder %s1324_s26, %s1320_s25  ;;  %p52_p1 = scmp.eq.s32.totalorder %s1336_s29, 0 }
   0xd   : > { %p57_p2 = scmp.ne.s32.totalorder %s1320_s25, %s1316_s24  ;;  %p1426_p3 = scmp.eq.s32.totalorder %s1662_s30, 0 }
   0xe   : > { %p867_p4 = scmp.ge.s32.totalorder %s1336_s29, 1  ;;  %p53_p5 = por %p52_p1, %p51_p0 }
   0xf   : > { %s1669_s8 = scalar_select %p1426_p3, 1, 0 }
  0x10   : > { %p220_p6 = scmp.lt.s32.totalorder %s1336_s29, 3  ;;  %p1434_p7 = por %p1426_p3, %p57_p2 }
  0x11   : > { %s1338_s11 = smov [#allocation6]   ;;  %p1035_p11 = scmp.lt.s32.totalorder %s1336_s29, 2 }
  0x12   : > { %s1670_s9 = scalar_select %p1434_p7, 1, 0 }
  0x13   : > { %p1438_p8 = pnand %p867_p4, %p220_p6  ;;  %s232_s12 = sshll.u32 %s1338_s11, 4  ;;  %s233_s12 = int_to_ptr.vmem [resolvable:$true] %s232_s12 }
  0x14   : > { %p1451_p12 = pnand %p1035_p11, %p53_p5  ;;  %s1134_s17 = scalar_lea.hbm %s1650_s1, 1024 }
  0x15   : > { %s1671_s10 = scalar_select %p1438_p8, 1, 0 }
  0x16   : > { %p1018_p9 = pneg %p1438_p8  ;;  %p1135_p13 = scmp.ne.s32.totalorder %s1650_s1, %s1134_s17 }
  0x17   : > { %s1673_s14 = scalar_select %p1451_p12, 1, 0 }
  0x18   : > { %p1446_p10 = pnand %p1018_p9, %p1426_p3  ;;  %p1141_p4 = scmp.lt.u32.totalorder %s1134_s17, %s1650_s1 }
  0x1a   : > { %p1463_p0 = pneg %p1446_p10 }
  0x1c   : > { %p1137_p1 = pnand %p1463_p0, %p1135_p13 }
  0x1e   : > { %p1138_p2 = pneg %p1137_p1 }
  0x20   : > { %p1143_p5 = pnand %p1141_p4, %p1138_p2 }
  0x22   : > { %1146 = shalt.err (!%p1143_p5)
}
  0x23   : > { %s1147_s23 = scalar_lea.vmem %s233_s12, 1024  ;;  %p1155_p3 = scmp.lt.s32.totalorder %s233_s12, %s233_s12 }
  0x24   : > { %p1148_p6 = scmp.ne.s32.totalorder %s233_s12, %s1147_s23  ;;  %p1156_p7 = scmp.lt.s32.totalorder %s1147_s23, %s1147_s23 }
  0x26   : > { %p1150_p9 = pnand %p1148_p6, %p1463_p0  ;;  %p1157_p8 = por %p1156_p7, %p1155_p3 }
  0x28   : > { %p1151_p11 = pneg %p1150_p9 }
  0x2a   : > { %p1158_p12 = pnand %p1157_p8, %p1151_p11 }
  0x2c   : > { %1161 = shalt.err (!%p1158_p12)
}
  0x2d   : > { %s1339_s24 = smov 64   ;;  %s1340_s11 = smov 4  }
  0x2e   : > { %1021 = dma.hbm_to_vmem [thread:$0]  (!%p1446_p10), %s1650_s1, 1024, %s233_s12, [#allocation7], %s1339_s24, %s1339_s24, %s1340_s11  }
  0x2f   : > { %s1341_s17 = smov [#allocation8]   ;;  %s1342_s19 = smov [#allocation9]  }
  0x30   : > { %s248_s18 = sshll.u32 %s1341_s17, 4  ;;  %s264_s21 = sshll.u32 %s1342_s19, 4  ;;  %s249_s18 = int_to_ptr.vmem [resolvable:$true] %s248_s18  ;;  %s265_s21 = int_to_ptr.vmem [resolvable:$true] %s264_s21 }
  0x31   : > { %s1162_s30 = scalar_lea.hbm %s1652_s3, 1024 }
  0x32   : > { %p1163_p3 = scmp.ne.s32.totalorder %s1652_s3, %s1162_s30  ;;  %p1169_p12 = scmp.lt.u32.totalorder %s1162_s30, %s1652_s3 }
  0x34   : > { %p1165_p7 = pnand %p1163_p3, %p1463_p0 }
  0x36   : > { %p1166_p8 = pneg %p1165_p7 }
  0x38   : > { %p1171_p13 = pnand %p1169_p12, %p1166_p8 }
  0x3a   : > { %1174 = shalt.err (!%p1171_p13)
}
  0x3b   : > { %s1175_s12 = scalar_lea.vmem %s249_s18, 1024  ;;  %p1183_p5 = scmp.lt.s32.totalorder %s249_s18, %s249_s18 }
  0x3c   : > { %p1176_p1 = scmp.ne.s32.totalorder %s249_s18, %s1175_s12  ;;  %p1184_p6 = scmp.lt.s32.totalorder %s1175_s12, %s1175_s12 }
  0x3e   : > { %p1178_p2 = pnand %p1176_p1, %p1463_p0  ;;  %p1185_p9 = por %p1184_p6, %p1183_p5 }
  0x40   : > { %p1179_p4 = pneg %p1178_p2 }
  0x42   : > { %p1186_p11 = pnand %p1185_p9, %p1179_p4 }
  0x44   : > { %1189 = shalt.err (!%p1186_p11)
}
  0x45   : > { %1024 = dma.hbm_to_vmem [thread:$0]  (!%p1446_p10), %s1652_s3, 1024, %s249_s18, [#allocation7], %s1339_s24, %s1339_s24, %s1340_s11  }
  0x46   : > { %s1190_s30 = scalar_lea.hbm %s1654_s5, 1024 }
  0x47   : > { %p1191_p3 = scmp.ne.s32.totalorder %s1654_s5, %s1190_s30  ;;  %p1197_p12 = scmp.lt.u32.totalorder %s1190_s30, %s1654_s5 }
  0x49   : > { %p1193_p7 = pnand %p1191_p3, %p1463_p0 }
  0x4b   : > { %p1194_p8 = pneg %p1193_p7 }
  0x4d   : > { %p1199_p13 = pnand %p1197_p12, %p1194_p8 }
  0x4f   : > { %1202 = shalt.err (!%p1199_p13)
}
  0x50   : > { %s1203_s22 = scalar_lea.vmem %s265_s21, 1024  ;;  %p1211_p5 = scmp.lt.s32.totalorder %s265_s21, %s265_s21 }
  0x51   : > { %p1204_p1 = scmp.ne.s32.totalorder %s265_s21, %s1203_s22  ;;  %p1212_p6 = scmp.lt.s32.totalorder %s1203_s22, %s1203_s22 }
  0x53   : > { %p1206_p2 = pnand %p1204_p1, %p1463_p0  ;;  %p1213_p9 = por %p1212_p6, %p1211_p5 }
  0x55   : > { %p1207_p4 = pneg %p1206_p2 }
  0x57   : > { %p1214_p11 = pnand %p1213_p9, %p1207_p4 }
  0x59   : > { %1217 = shalt.err (!%p1214_p11)
}
  0x5a   : > { %1027 = dma.hbm_to_vmem [thread:$0]  (!%p1446_p10), %s1654_s5, 1024, %s265_s21, [#allocation10], %s1339_s24, %s1339_s24, %s1340_s11  }
  0x5b   : > { %s44_s20 = sadd.s32 1, %s1324_s26  ;;  %s32_s12 = sadd.s32 1, %s1332_s28 }
  0x5c   : > { %s281_s4 = sand.u32 1, %s1324_s26   ;;  %p33_p0 = scmp.ge.s32.totalorder %s32_s12, 2 }
  0x5d   : > { %s872_s13 = sshll.u32 %s281_s4, 3  ;;  %s873_s6 = sshll.u32 %s1332_s28, 6 }
  0x5e   : > { %s1692_s12 = smov (%p33_p0, %s32_s12), 0  ;;  %s1533_s30 = scalar_lea.hbm %s1649_s0, %s873_s6 }
  0x5f   : > { %s40_s21 = ssub.s32 %s1332_s28, %s1692_s12  ;;  %s285_s15 = scalar_lea.vmem [#allocation3], %s872_s13 }
  0x60   : > { %s294_s16 = sshll.u32 %s285_s15, 4  ;;  %p42_p10 = scmp.eq.s32.totalorder %s40_s21, 0  ;;  %s1537_s16 = int_to_ptr.vmem [resolvable:$true] %s294_s16 }
  0x61   : > { %s1542_s19 = scalar_lea.sflag [#allocation4], %s281_s4  ;;  %s1218_s22 = scalar_lea.hbm %s1533_s30, 128 }
  0x62   : > { %s1540_s17 = scalar_select %p42_p10, %s1324_s26, %s44_s20  }
  0x63   : > { %p1219_p3 = scmp.ne.s32.totalorder %s1533_s30, %s1218_s22  ;;  %p1675_p7 = scmp.ne.s32.totalorder %s1673_s14, 0 }
  0x64   : > { %s1223_s13 = scalar_lea.hbm %s1649_s0, 256  ;;  %p1224_p1 = scmp.lt.u32.totalorder %s1533_s30, %s1649_s0 }
  0x65   : > { %p1220_p8 = pneg %p1675_p7  ;;  %p1225_p2 = scmp.lt.u32.totalorder %s1223_s13, %s1218_s22 }
  0x66   : > { %p1227_p5 = scmp.lt.u32.totalorder %s1218_s22, %s1533_s30 }
  0x67   : > { %p1221_p12 = pnand %p1220_p8, %p1219_p3  ;;  %p1226_p4 = por %p1225_p2, %p1224_p1 }
  0x69   : > { %p1222_p13 = pneg %p1221_p12  ;;  %p1228_p6 = por %p1227_p5, %p1226_p4 }
  0x6b   : > { %p1229_p9 = pnand %p1228_p6, %p1222_p13 }
  0x6d   : > { %1232 = shalt.err (!%p1229_p9)
}
  0x6e   : > { %s1233_s20 = scalar_lea.vmem %s1537_s16, 128  ;;  %s1343_s4 = smov [#allocation3]  }
  0x6f   : > { %p1234_p11 = scmp.ne.s32.totalorder %s1537_s16, %s1233_s20  ;;  %s1238_s29 = sshll.u32 %s1343_s4, 4  ;;  %s1239_s29 = int_to_ptr.vmem [resolvable:$false] %s1238_s29 }
  0x70   : > { %s1240_s21 = scalar_lea.vmem %s1239_s29, 256  ;;  %p1241_p3 = scmp.lt.s32.totalorder %s1537_s16, %s1239_s29 }
  0x71   : > { %p1236_p0 = pnand %p1234_p11, %p1220_p8  ;;  %p1242_p12 = scmp.lt.s32.totalorder %s1240_s21, %s1233_s20 }
  0x73   : > { %p1237_p10 = pneg %p1236_p0  ;;  %p1243_p1 = por %p1242_p12, %p1241_p3 }
  0x75   : > { %p1244_p2 = pnand %p1243_p1, %p1237_p10 }
  0x77   : > { %1247 = shalt.err (!%p1244_p2)
}
  0x78   : > { %s1344_s15 = smov 128   ;;  %p1676_p8 = scmp.ne.s32.totalorder %s1671_s10, 0 }
  0x79   : > { %1031 = dma.hbm_to_vmem [thread:$0]  (!%p1675_p7), %s1533_s30, 128, %s1537_s16, %s1542_s19, %s1344_s15, %s1339_s24, %s1340_s11  }
  0x7a   : > { %306 = sbr.rel (%p1676_p8) target bundleno = 938 (0x3aa), region = 48  ;;  %s308_s22 = sand.u32 (!%p1676_p8), 1, %s1320_s25  }
  0x7b   : > { %s1575_s18 = sshll.u32 (!%p1676_p8), %s308_s22, 3  ;;  %s309_s23 = scalar_lea.sflag (!%p1676_p8), [#allocation4], %s308_s22 }
  0x7c   : > { %s312_s13 = scalar_lea.vmem (!%p1676_p8), [#allocation3], %s1575_s18  ;;  %p1677_p13 = scmp.ne.s32.totalorder (!%p1676_p8), %s1670_s9, 0 }
  0x81   : > { %1299 = dma.done.wait (%p1677_p13), %s309_s23, 128  }
  0x82   : > { %1301 = vsyncadd (%p1677_p13), %s309_s23, 4294967168  ;;  %p1678_p4 = scmp.ne.s32.totalorder %s1669_s8, 0 }
  0x84   : > { %1303 = dma.done.wait (%p1678_p4), [#allocation7], 2048  }
  0x85   : > { %1305 = vsyncadd (%p1678_p4), [#allocation7], 4294965248 }
  0x86   : > { %1307 = dma.done.wait (%p1678_p4), [#allocation10], 1024  }
  0x87   : > { %1309 = vsyncadd (%p1678_p4), [#allocation10], 4294966272  ;;  %p879_p7 = scmp.ne.s32.totalorder %s1328_s27, 0 }
  0x88   : > { %v1345_v0 = vmov (!%p879_p7), 0.0  }
  0x89   : > { %355 = sbr.rel (%p879_p7) target bundleno = 144 (0x90), region = 68  ;;  %356 = vst [vmem:[#allocation2] sm:$0x3] (!%p879_p7), %v1345_v0 }
  0x90 PF: > { %v1101_v1 = vld [vmem:[#allocation6] sm:$0xff]   ;;  %v1346_v2 = vmov 0.0   ;;  %v1102_v3 = vld [vmem:[#allocation6 + $0x8] sm:$0xff]   ;;  %vm1347_vm0 = vmmov 0   ;;  %v1103_v4 = vld [vmem:[#allocation6 + $0x10] sm:$0xff]   ;;  %s1679_s24 = sld [smem:[#allocation17_spill]] }
  0x91   : > { %940 = vmatprep.subr.bf16.mxu0 %v1346_v2  ;;  %960 = vmatprep.subr.bf16.mxu1 %v1346_v2  ;;  %v1104_v5 = vld [vmem:[#allocation6 + $0x18] sm:$0xff]   ;;  %v1105_v6 = vld [vmem:[#allocation6 + $0x20] sm:$0xff]   ;;  %v1106_v7 = vld [vmem:[#allocation6 + $0x28] sm:$0xff]   ;;  %vm641_vm1 = vcmask 1041409   ;;  %p899_p5 = scmp.ne.s32.totalorder %s1328_s27, 1 }
  0x92   : > { %941 = vmatpush3.bf16.msra.mxu0 %v1101_v1  ;;  %956 = vmatprep.mubr.msk.bf16.mxu0 %vm1347_vm0, %v1346_v2  ;;  %v1107_v8 = vld [vmem:[#allocation6 + $0x30] sm:$0xff]   ;;  %v1108_v9 = vld [vmem:[#allocation6 + $0x38] sm:$0xff]   ;;  %v1110_v11 = vld [vmem:[#allocation8] sm:$0xff]   ;;  %vm1349_vm2 = vmmov (!%p899_p5), 0   ;;  %s1680_s30 = sld [smem:[#allocation18_spill]] (!%p899_p5) }
  0x93   : > { %942 = vmatprep.subr.bf16.mxu0 %v1346_v2  ;;  %976 = vmatprep.mubr.msk.bf16.mxu1 %vm1347_vm0, %v1346_v2  ;;  %v1109_v10 = vld [vmem:[%s312_s13] sm:$0xff]   ;;  %v1111_v12 = vld [vmem:[#allocation8 + $0x8] sm:$0xff]   ;;  %v1114_v15 = vld [vmem:[#allocation8 + $0x20] sm:$0xff]  }
  0x94   : > { %961 = vmatpush3.bf16.msra.mxu1 %v1110_v11  ;;  %v1112_v13 = vld [vmem:[#allocation8 + $0x10] sm:$0xff]   ;;  %v1113_v14 = vld [vmem:[#allocation8 + $0x18] sm:$0xff]   ;;  %v1115_v16 = vld [vmem:[#allocation8 + $0x28] sm:$0xff]  }
  0x95   : > { %962 = vmatprep.subr.bf16.mxu1 %v1346_v2  ;;  %v1116_v17 = vld [vmem:[#allocation8 + $0x30] sm:$0xff]   ;;  %v1117_v18 = vld [vmem:[#allocation8 + $0x38] sm:$0xff]   ;;  %v880_v19 = vld [vmem:[%s1651_s2] ss:$0 sm:$0xff] }
  0x96   : > { %943 = vmatpush3.bf16.msra.mxu0 %v1102_v3  ;;  %v890_v45 = vld [vmem:[%s1679_s24] ss:$0 sm:$0xff] }
  0x97   : > { %944 = vmatprep.subr.bf16.mxu0 %v1346_v2 }
  0x98   : > { %963 = vmatpush3.bf16.msra.mxu1 %v1111_v12 }
  0x99   : > { %964 = vmatprep.subr.bf16.mxu1 %v1346_v2 }
  0x9a   : > { %945 = vmatpush3.bf16.msra.mxu0 %v1103_v4 }
  0x9b   : > { %946 = vmatprep.subr.bf16.mxu0 %v1346_v2 }
  0x9c   : > { %965 = vmatpush3.bf16.msra.mxu1 %v1112_v13 }
  0x9d   : > { %966 = vmatprep.subr.bf16.mxu1 %v1346_v2 }
  0x9e   : > { %947 = vmatpush3.bf16.msra.mxu0 %v1104_v5 }
  0x9f   : > { %948 = vmatprep.subr.bf16.mxu0 %v1346_v2 }
  0xa0   : > { %967 = vmatpush3.bf16.msra.mxu1 %v1113_v14 }
  0xa1   : > { %968 = vmatprep.subr.bf16.mxu1 %v1346_v2 }
  0xa2   : > { %949 = vmatpush3.bf16.msra.mxu0 %v1105_v6 }
  0xa3   : > { %950 = vmatprep.subr.bf16.mxu0 %v1346_v2 }
  0xa4   : > { %969 = vmatpush3.bf16.msra.mxu1 %v1114_v15 }
  0xa5   : > { %970 = vmatprep.subr.bf16.mxu1 %v1346_v2 }
  0xa6   : > { %951 = vmatpush3.bf16.msra.mxu0 %v1106_v7 }
  0xa7   : > { %952 = vmatprep.subr.bf16.mxu0 %v1346_v2 }
  0xa8   : > { %971 = vmatpush3.bf16.msra.mxu1 %v1115_v16 }
  0xa9   : > { %972 = vmatprep.subr.bf16.mxu1 %v1346_v2 }
  0xaa   : > { %953 = vmatpush3.bf16.msra.mxu0 %v1107_v8 }
  0xab   : > { %954 = vmatprep.subr.bf16.mxu0 %v1346_v2 }
  0xac   : > { %973 = vmatpush3.bf16.msra.mxu1 %v1116_v17  ;;  %v626_v17 = vld [vmem:[#allocation2] sm:$0x3] }
  0xad   : > { %974 = vmatprep.subr.bf16.mxu1 %v1346_v2 }
  0xae   : > { %955 = vmatpush3.bf16.msra.mxu0 %v1108_v9 }
  0xb0   : > { %975 = vmatpush3.bf16.msra.mxu1 %v1117_v18 }
  0xb1   : > { %957 = vmatmul.mubr.bf16.vlgmr.msra.gmra.mrb[0].mxu0 %v1109_v10 }
 0x184   : > { %v470_v20 = vpop.f32.mrb[0].mxu0 }
 0x185   : > { %v471_v21 = vadd.f32 %v880_v19, %v470_v20  ;;  %v958_v22 = vpop.f32.mrb[1].mxu0 }
 0x186   : > { %v473_v23 = vpop.f32.mrb[2].mxu0  ;;  %v1348_v22 = vmov (!%p899_p5), 0.0  }
 0x187   : > { %v479_v24 = vmul.f32 0.044715, %v471_v21  ;;  %v474_v25 = vadd.f32 %v880_v19, %v473_v23  ;;  %v959_v26 = vpop.f32.mrb[3].mxu0  ;;  %v477_v39 = vmul.f32 0.5, %v471_v21  ;;  %980 = vmatprep.subr.bf16.mxu0 (!%p899_p5), %v1348_v22  ;;  %v1127_v23 = vld [vmem:[#allocation9 + $0x8] sm:$0xff] (!%p899_p5)   ;;  %996 = vmatprep.mubr.msk.bf16.mxu0 (!%p899_p5), %vm1349_vm2, %v1348_v22 }
 0x188   : > { %v1130_v26 = vld [vmem:[#allocation9 + $0x20] sm:$0xff] (!%p899_p5)  }
 0x189   : > { %v481_v27 = vmul.f32 %v479_v24, %v471_v21  ;;  %v480_v28 = vmul.f32 0.044715, %v474_v25  ;;  %v478_v40 = vmul.f32 0.5, %v474_v25  ;;  %v1128_v24 = vld [vmem:[#allocation9 + $0x10] sm:$0xff] (!%p899_p5)  }
 0x18b   : > { %v483_v29 = vmul.f32 %v481_v27, %v471_v21  ;;  %v482_v30 = vmul.f32 %v480_v28, %v474_v25  ;;  %v1131_v27 = vld [vmem:[#allocation9 + $0x28] sm:$0xff] (!%p899_p5)   ;;  %v1132_v28 = vld [vmem:[#allocation9 + $0x30] sm:$0xff] (!%p899_p5)  }
 0x18d   : > { %v484_v31 = vmul.f32 %v482_v30, %v474_v25  ;;  %v485_v32 = vadd.f32 %v483_v29, %v471_v21  ;;  %v1126_v21 = vld [vmem:[#allocation9] sm:$0xff] (!%p899_p5)  }
 0x18e   : > { %981 = vmatpush3.bf16.msra.mxu0 (!%p899_p5), %v1126_v21 }
 0x18f   : > { %v486_v33 = vadd.f32 %v484_v31, %v474_v25  ;;  %v487_v34 = vmul.f32 0.7978846, %v485_v32  ;;  %982 = vmatprep.subr.bf16.mxu0 (!%p899_p5), %v1348_v22  ;;  %v1129_v25 = vld [vmem:[#allocation9 + $0x18] sm:$0xff] (!%p899_p5)  }
 0x190   : > { %v1133_v31 = vld [vmem:[#allocation9 + $0x38] sm:$0xff] (!%p899_p5)  }
 0x191   : > { %v488_v35 = vmul.f32 0.7978846, %v486_v33  ;;  %1118 = vtanh.f32 %v487_v34  ;;  %v900_v33 = vld [vmem:[%s1680_s30] ss:$0 sm:$0xff] (!%p899_p5) }
 0x192   : > { %983 = vmatpush3.bf16.msra.mxu0 (!%p899_p5), %v1127_v23 }
 0x193   : > { %1120 = vtanh.f32 %v488_v35  ;;  %984 = vmatprep.subr.bf16.mxu0 (!%p899_p5), %v1348_v22 }
 0x196   : > { %985 = vmatpush3.bf16.msra.mxu0 (!%p899_p5), %v1128_v24 }
 0x197   : > { %986 = vmatprep.subr.bf16.mxu0 (!%p899_p5), %v1348_v22 }
 0x19a   : > { %987 = vmatpush3.bf16.msra.mxu0 (!%p899_p5), %v1129_v25 }
 0x19b   : > { %v1119_v36 = vpop.eup %1118  ;;  %988 = vmatprep.subr.bf16.mxu0 (!%p899_p5), %v1348_v22 }
 0x19c   : > { %v491_v37 = vadd.f32 1.0, %v1119_v36 }
 0x19d   : > { %v1121_v38 = vpop.eup %1120 }
 0x19e   : > { %v492_v41 = vadd.f32 1.0, %v1121_v38  ;;  %v493_v42 = vmul.f32 %v491_v37, %v477_v39  ;;  %989 = vmatpush3.bf16.msra.mxu0 (!%p899_p5), %v1130_v26 }
 0x19f   : > { %990 = vmatprep.subr.bf16.mxu0 (!%p899_p5), %v1348_v22 }
 0x1a0   : > { %v494_v43 = vmul.f32 %v492_v41, %v478_v40 }
 0x1a2   : > { %v495_v44 = vpack.c.bf16 %v494_v43, %v493_v42  ;;  %991 = vmatpush3.bf16.msra.mxu0 (!%p899_p5), %v1131_v27 }
 0x1a3   : > { %992 = vmatprep.subr.bf16.mxu0 (!%p899_p5), %v1348_v22 }
 0x1a4   : > { %977 = vmatmul.mubr.bf16.vlgmr.msra.gmra.mrb[0].mxu1 %v495_v44 }
 0x1a6   : > { %993 = vmatpush3.bf16.msra.mxu0 (!%p899_p5), %v1132_v28 }
 0x1a7   : > { %994 = vmatprep.subr.bf16.mxu0 (!%p899_p5), %v1348_v22 }
 0x1aa   : > { %995 = vmatpush3.bf16.msra.mxu0 (!%p899_p5), %v1133_v31 }
 0x277   : > { %v601_v46 = vpop.f32.mrb[0].mxu1 }
 0x278   : > { %v602_v47 = vadd.f32 %v890_v45, %v601_v46  ;;  %v978_v48 = vpop.f32.mrb[1].mxu1 }
 0x279   : > { %v604_v49 = vpop.f32.mrb[2].mxu1 }
 0x27a   : > { %v610_v50 = vmul.f32 0.044715, %v602_v47  ;;  %v605_v51 = vadd.f32 %v890_v45, %v604_v49  ;;  %v979_v52 = vpop.f32.mrb[3].mxu1  ;;  %v608_v63 = vmul.f32 0.5, %v602_v47 }
 0x27c   : > { %v612_v53 = vmul.f32 %v610_v50, %v602_v47  ;;  %v611_v54 = vmul.f32 0.044715, %v605_v51  ;;  %v609_v3 = vmul.f32 0.5, %v605_v51 }
 0x27e   : > { %v614_v55 = vmul.f32 %v612_v53, %v602_v47  ;;  %v613_v56 = vmul.f32 %v611_v54, %v605_v51 }
 0x280   : > { %v616_v57 = vadd.f32 %v614_v55, %v602_v47  ;;  %v615_v58 = vmul.f32 %v613_v56, %v605_v51 }
 0x282   : > { %v618_v59 = vmul.f32 0.7978846, %v616_v57  ;;  %v617_v60 = vadd.f32 %v615_v58, %v605_v51 }
 0x284   : > { %1122 = vtanh.f32 %v618_v59  ;;  %v619_v61 = vmul.f32 0.7978846, %v617_v60 }
 0x286   : > { %1124 = vtanh.f32 %v619_v61 }
 0x28e   : > { %v1123_v62 = vpop.eup %1122 }
 0x28f   : > { %v622_v0 = vadd.f32 1.0, %v1123_v62 }
 0x290   : > { %v1125_v1 = vpop.eup %1124 }
 0x291   : > { %v624_v2 = vmul.f32 %v622_v0, %v608_v63  ;;  %v623_v4 = vadd.f32 1.0, %v1125_v1 }
 0x293   : > { %v627_v5 = vrot.slane %v624_v2, 4  ;;  %v625_v6 = vmul.f32 %v623_v4, %v609_v3 }
 0x295   : > { %v628_v7 = vadd.f32 %v627_v5, %v624_v2  ;;  %v633_v8 = vrot.slane %v625_v6, 4 }
 0x297   : > { %v629_v9 = vrot.slane %v628_v7, 2  ;;  %v634_v10 = vadd.f32 %v633_v8, %v625_v6 }
 0x299   : > { %v630_v11 = vadd.f32 %v629_v9, %v628_v7  ;;  %v635_v12 = vrot.slane %v634_v10, 2 }
 0x29b   : > { %v631_v13 = vrot.slane %v630_v11, 1  ;;  %v636_v14 = vadd.f32 %v635_v12, %v634_v10 }
 0x29d   : > { %v637_v15 = vrot.slane %v636_v14, 1  ;;  %v632_v16 = vadd.f32 %v631_v13, %v630_v11 }
 0x29e   : > { %649 = sbr.rel (%p899_p5) target bundleno = 903 (0x387), region = 72 }
 0x29f   : > { %v638_v18 = vadd.f32 %v637_v15, %v636_v14 }
 0x2a1   : > { %v642_v19 = vsel %vm641_vm1, %v638_v18, %v632_v16 }
 0x2a2   : > { %v644_v20 = vadd.f32 %v642_v19, %v626_v17 }
 0x2a4   : > { %645 = vst [vmem:[#allocation2] sm:$0x3] %v644_v20 }
 0x2ab   : > { %v650_v29 = vld [vmem:[#allocation2] sm:$0x3] }
 0x2ac   : > { %v651_v30 = vmul.f32 0.0625, %v650_v29 }
 0x2ae   : > { %v652_v32 = vpack.c.bf16 %v651_v30, %v651_v30 }
 0x2b0   : > { %997 = vmatmul.mubr.bf16.vlgmr.msra.gmra.mrb[0].mxu0 %v652_v32 }
 0x383   : > { %v758_v34 = vpop.f32.mrb[0].mxu0 }
 0x384   : > { %v759_v35 = vadd.f32 %v900_v33, %v758_v34  ;;  %v998_v36 = vpop.f32.mrb[1].mxu0 }
 0x385   : > { %v761_v37 = vpop.f32.mrb[2].mxu0 }
 0x386   : > { %764 = vst [vmem:[#allocation11] sm:$0x3] %v759_v35  ;;  %v999_v38 = vpop.f32.mrb[3].mxu0 }
 0x387 PF: > { %s1681_s16 = sld [smem:[#allocation16_spill]]  ;;  %s1350_s7 = smov [#allocation11]  }
 0x388   : > { %s774_s20 = sshll.u32 %s1350_s7, 4  ;;  %s775_s20 = int_to_ptr.vmem [resolvable:$true] %s774_s20 }
 0x389   : > { %s1248_s4 = scalar_lea.vmem %s775_s20, 32  ;;  %p1255_p10 = scmp.lt.s32.totalorder %s775_s20, %s775_s20 }
 0x38a   : > { %p1249_p9 = scmp.ne.s32.totalorder %s775_s20, %s1248_s4  ;;  %p1256_p3 = scmp.lt.s32.totalorder %s1248_s4, %s1248_s4 }
 0x38c   : > { %p1257_p12 = por %p1256_p3, %p1255_p10 }
 0x38d   : > { %s1682_s19 = sadd.s32 4294967295, %s1681_s16  }
 0x38e   : > { %p1605_p6 = scmp.eq.s32.totalorder %s1682_s19, 1 }
 0x390   : > { %p1250_p11 = pnand %p1249_p9, %p1605_p6 }
 0x392   : > { %p1251_p0 = pneg %p1250_p11 }
 0x394   : > { %p1258_p1 = pnand %p1257_p12, %p1251_p0 }
 0x396   : > { %1261 = shalt.err (!%p1258_p1)
}
 0x397   : > { %s1684_s15 = sld [smem:[#allocation19_spill]] }
 0x39d   : > { %s1262_s22 = scalar_lea.hbm %s1684_s15, 32 }
 0x39e   : > { %p1263_p2 = scmp.ne.s32.totalorder %s1684_s15, %s1262_s22  ;;  %p1268_p4 = scmp.lt.u32.totalorder %s1262_s22, %s1684_s15 }
 0x3a0   : > { %p1264_p8 = pnand %p1263_p2, %p1605_p6 }
 0x3a2   : > { %p1265_p13 = pneg %p1264_p8 }
 0x3a4   : > { %p1270_p7 = pnand %p1268_p4, %p1265_p13 }
 0x3a6   : > { %1273 = shalt.err (!%p1270_p7)
}
 0x3a7   : > { %1015 = dma.vmem_to_hbm [thread:$0]  (%p1605_p6), %s775_s20, 32, %s1684_s15, [#allocation5]  }
 0x3a8   : > { %1311 = dma.done.wait (%p1605_p6), [#allocation5], 32  }
 0x3a9   : > { %1313 = vsyncadd (%p1605_p6), [#allocation5], 4294967264 }
 0x3aa PF: > { %s1685_s14 = sld [smem:[#allocation16_spill]]  ;;  %s1686_s24 = smov %s1320_s25 }
 0x3ab   : > { %s1687_s25 = smov %s1324_s26  ;;  %s1688_s26 = smov %s1540_s17 }
 0x3ac   : > { %s1689_s27 = smov %s1332_s28  ;;  %s1690_s28 = smov %s1692_s12 }
 0x3b0   : > { %s23_s29 = sadd.s32 1, %s1685_s14  }
 0x3b1   : > { %p20_p5 = scmp.ge.s32.totalorder %s23_s29, 4  }
 0x3b3   :  { %22 = sbr.rel (!%p20_p5) target bundleno = 11 (0xb), region = 106 }
 0x3ba   :  { %787 = vsyncpa [#allocation4], 1 }
 0x3bb   :  { %789 = vsyncpa [#allocation4 + $0x1], 1 }
 0x3bc   :  { %790 = vsyncpa [#allocation7], 1 }
 0x3bd   :  { %791 = vsyncpa [#allocation10], 1 }
 0x3be   :  { %792 = vsyncpa [#allocation5], 1 }
 0x3bf   :  { %794 = vsyncpa [#allocation5 + $0x1], 1 }

</bundles_post_ra>
